<compile_context>
chip_gen: v6e
topology: v6e:2x2x1
jax: 0.10.0
libtpu: 0.0.40
codegen_flags: <defaults>
</compile_context>

<pallas_src>
import jax
import jax.numpy as jnp
from jax.experimental import pallas as pl
from jax.experimental.pallas import tpu as pltpu


def _round_up(x: int, m: int) -> int:
    return (x + m - 1) // m * m


def _cdiv(a: int, b: int) -> int:
    return -(-a // b)


def _vmem_limit_bytes() -> int:
    kind = ""
    try:
        kind = jax.devices()[0].device_kind.lower()
    except Exception:
        pass
    if "v7" in kind:
        return 48 * 1024 * 1024          # v7x: 64 MiB physical per TensorCore
    if "v5" in kind or "v6" in kind:
        return 100 * 1024 * 1024         # v5e/v6e: 128 MiB physical VMEM
    return 48 * 1024 * 1024              # unknown generation -> conservative


def _decoder_kernel(x_ref, w1_ref, b1_ref, w2_ref, b2_ref, o_ref, h_ref):
    # Layer 1 (latent -> metapathway) depends only on the batch tile `i`.
    # Axis 1 (graph tiles) is "arbitrary" and innermost, so compute h on its
    # first iteration and keep it resident in bf16 VMEM scratch for all
    # subsequent graph tiles of this batch tile.
    @pl.when(pl.program_id(1) == 0)
    def _():
        h = (jnp.dot(x_ref[...], w1_ref[...],
                     preferred_element_type=jnp.float32) + b1_ref[...])
        # TODO(synk): activation for PathwayToMetapathwayDecoder (if any) here.
        h_ref[...] = h.astype(h_ref.dtype)     # single cast per batch tile

    # Layer 2 (metapathway -> graph nodes): one lane-dense output tile.
    out = (jnp.dot(h_ref[...], w2_ref[...],
                   preferred_element_type=jnp.float32) + b2_ref[...])
    # TODO(synk): activation for MetapathwayGraphDecoder (if any) here.
    o_ref[...] = out.astype(o_ref.dtype)


def prepare_decoder_params(w1, latent_mask, b1, w2, graph_mask, b2,
                           *, compute_dtype=jnp.bfloat16):
    """One-time parameter prep (call at parameter-load time, NOT per forward):
    fold static connectivity masks into the weights, transpose to
    [in_features, out_features], pad feature dims to lane multiples (128), and
    cast weights to the MXU compute dtype (bf16).  Biases stay fp32.
    """
    M, L = w1.shape
    G, M2 = w2.shape
    assert M2 == M, "graph_mask.shape[1] must equal latent_mask.shape[0]"
    Lp, Mp, Gp = _round_up(L, 128), _round_up(M, 128), _round_up(G, 128)

    w1t = jnp.pad((w1 * latent_mask).T, ((0, Lp - L), (0, Mp - M)))
    w2t = jnp.pad((w2 * graph_mask).T, ((0, Mp - M), (0, Gp - G)))
    b1p = jnp.pad(jnp.reshape(b1, (1, -1)), ((0, 0), (0, Mp - M)))
    b2p = jnp.pad(jnp.reshape(b2, (1, -1)), ((0, 0), (0, Gp - G)))
    return dict(
        w1t=w1t.astype(compute_dtype),
        b1=b1p.astype(jnp.float32),
        w2t=w2t.astype(compute_dtype),
        b2=b2p.astype(jnp.float32),
        dims=(L, M, G),
    )


def decoder_forward(x, params, *, tb=None, tn=None, out_dtype=None):
    """Fused two-layer masked-linear decoder.  x: [B, latent_dim] -> [B, G]."""
    L, M, G = params["dims"]
    w1t, b1, w2t, b2 = params["w1t"], params["b1"], params["w2t"], params["b2"]
    Lp, Mp = w1t.shape
    Gp = w2t.shape[1]
    B = x.shape[0]
    out_dtype = out_dtype or x.dtype
    cdt = w1t.dtype
    cbytes = jnp.dtype(cdt).itemsize
    obytes = jnp.dtype(out_dtype).itemsize
    sub = 16 if cdt == jnp.bfloat16 else 8   # sublane packing of compute dtype

    # ---- batch tile ---------------------------------------------------------
    Bp0 = _round_up(B, sub)
    if tb is None:
        # Large tb amortizes the per-batch-tile W2 re-stream and fills the
        # 256-wide MXU, but keep >=2 batch tiles when possible so both v7x
        # TensorCores get work along the "parallel" axis.
        n_tiles = max(2 if Bp0 > sub else 1, _cdiv(Bp0, 256))
        tb = _round_up(_cdiv(Bp0, n_tiles), sub)
    else:
        tb = _round_up(tb, sub)
    Bp = _round_up(Bp0, tb)

    # ---- graph tile, sized to the per-generation VMEM budget ---------------
    vmem_limit = _vmem_limit_bytes()
    budget = int(vmem_limit * 0.85)

    def pick_tn(max_tn):
        t = max(128, min(max_tn, Gp) // 128 * 128)
        while Gp % t:                        # Gp is a multiple of 128
            t -= 128
        return t

    def vmem_est(tn_):
        return (2 * tb * Lp * cbytes         # x tile       (double-buffered)
                + Lp * Mp * cbytes           # W1^T         (resident, 1 buf)
                + Mp * 4                     # b1           (resident)
                + 2 * Mp * tn_ * cbytes      # W2^T tile    (double-buffered)
                + 2 * tn_ * 4                # b2 tile
                + 2 * tb * tn_ * obytes      # output tile  (double-buffered)
                + tb * Mp * cbytes)          # h scratch

    tn = pick_tn(512 if tn is None else tn)
    while vmem_est(tn) > budget and tn > 128:
        tn = pick_tn(tn - 128)
    # TODO(synk): if W1^T residency (Lp*Mp) alone exceeds the VMEM budget,
    # stream it over an extra K grid axis (pltpu.emit_pipeline) instead.

    # ---- pad + cast activations ---------------------------------------------
    xp = x.astype(cdt)
    if Bp != B or Lp != L:
        xp = jnp.pad(xp, ((0, Bp - B), (0, Lp - L)))

    n_btiles = Bp // tb
    cost = pl.CostEstimate(
        flops=2 * Bp * Lp * Mp + 2 * Bp * Mp * Gp,
        transcendentals=0,
        bytes_accessed=(Bp * Lp * cbytes
                        + Lp * Mp * cbytes + Mp * 4
                        # W2^T / b2 are re-streamed once per batch tile:
                        + n_btiles * (Mp * Gp * cbytes + Gp * 4)
                        + Bp * Gp * obytes),
    )

    def build(resident_pipeline_mode):
        kw = ({} if resident_pipeline_mode is None
              else dict(pipeline_mode=resident_pipeline_mode))
        grid_spec = pltpu.PrefetchScalarGridSpec(
            num_scalar_prefetch=0,
            grid=(Bp // tb, Gp // tn),
            in_specs=[
                pl.BlockSpec((tb, Lp), lambda i, j: (i, 0)),            # x
                pl.BlockSpec((Lp, Mp), lambda i, j: (0, 0), **kw),      # W1^T
                pl.BlockSpec((1, Mp), lambda i, j: (0, 0), **kw),       # b1
                pl.BlockSpec((Mp, tn), lambda i, j: (0, j)),            # W2^T
                pl.BlockSpec((1, tn), lambda i, j: (0, j)),             # b2
            ],
            out_specs=pl.BlockSpec((tb, tn), lambda i, j: (i, j)),
            scratch_shapes=[pltpu.VMEM((tb, Mp), cdt)],   # h (layer-1 output)
        )
        return pl.pallas_call(
            _decoder_kernel,
            out_shape=jax.ShapeDtypeStruct((Bp, Gp), out_dtype),
            grid_spec=grid_spec,
            compiler_params=pltpu.CompilerParams(
                dimension_semantics=("parallel", "arbitrary"),
                vmem_limit_bytes=vmem_limit,
            ),
            cost_estimate=cost,
        )

    try:
        # Constant-index operands only need one VMEM buffer.
        out = build(pl.Buffered(1))(xp, w1t, b1, w2t, b2)
    except Exception:
        out = build(None)(xp, w1t, b1, w2t, b2)

    if Bp == B and Gp == G:
        return out
    return out[:B, :G]


# ----------------------------------------------------------------------------
# Self-test helpers.
# ----------------------------------------------------------------------------
def _make_params(key, B, L, M, G):
    kx, km1, km2, kw1, kb1, kw2, kb2 = jax.random.split(key, 7)
    x = jax.random.normal(kx, (B, L), dtype=jnp.float32)
    latent_mask = (jax.random.uniform(km1, (M, L)) < 0.5).astype(jnp.float32)
    graph_mask = (jax.random.uniform(km2, (G, M)) < 0.5).astype(jnp.float32)
    bound1 = 1.0 / (L ** 0.5)
    w1 = jax.random.uniform(kw1, (M, L), minval=-bound1, maxval=bound1,
                            dtype=jnp.float32)
    b1 = jax.random.uniform(kb1, (M,), minval=-bound1, maxval=bound1,
                            dtype=jnp.float32)
    bound2 = 1.0 / (M ** 0.5)
    w2 = jax.random.uniform(kw2, (G, M), minval=-bound2, maxval=bound2,
                            dtype=jnp.float32)
    b2 = jax.random.uniform(kb2, (G,), minval=-bound2, maxval=bound2,
                            dtype=jnp.float32)
    return x, w1, latent_mask, b1, w2, graph_mask, b2


def _reference_f32(x, w1, m1, b1, w2, m2, b2):
    hp = jax.lax.Precision.HIGHEST
    h = jnp.dot(x, (w1 * m1).T, precision=hp) + b1[None, :]
    return jnp.dot(h, (w2 * m2).T, precision=hp) + b2[None, :]


def _reference_bf16(x, w1, m1, b1, w2, m2, b2):
    # Same operand quantization as the kernel (bf16 inputs, fp32 accumulate).
    hp = jax.lax.Precision.HIGHEST
    q = lambda a: a.astype(jnp.bfloat16).astype(jnp.float32)
    h = jnp.dot(q(x), q((w1 * m1).T), precision=hp) + b1[None, :]
    return jnp.dot(q(h), q((w2 * m2).T), precision=hp) + b2[None, :]


if __name__ == "__main__":
    key = jax.random.PRNGKey(0)
    k1, k2 = jax.random.split(key)

    # Test 1: small shapes implied by the module (latent -> meta -> graph).
    B, LATENT, META, GRAPH = 4, 16, 32, 64
    args = _make_params(k1, B, LATENT, META, GRAPH)
    x1 = args[0]
    params1 = prepare_decoder_params(*args[1:])
    out1 = jax.block_until_ready(decoder_forward(x1, params1))
    ref1_q = _reference_bf16(*args)
    ref1_f = _reference_f32(*args)
    assert out1.shape == (B, GRAPH)
    assert jnp.allclose(out1, ref1_q, atol=1e-2, rtol=1e-2)
    rel1 = float(jnp.linalg.norm(out1 - ref1_f) / (jnp.linalg.norm(ref1_f) + 1e-12))
    assert rel1 < 0.05

    # Test 2: uneven shapes exercising the (batch x graph-tile) grid, padding,
    # and reuse of the layer-1 scratch across graph tiles (tn=128 -> 3 tiles).
    B2, L2, M2, G2 = 20, 40, 96, 300
    args2 = _make_params(k2, B2, L2, M2, G2)
    x2 = args2[0]
    params2 = prepare_decoder_params(*args2[1:])
    out2 = jax.block_until_ready(decoder_forward(x2, params2, tb=16, tn=128))
    ref2_q = _reference_bf16(*args2)
    ref2_f = _reference_f32(*args2)
    assert out2.shape == (B2, G2)
    assert jnp.allclose(out2, ref2_q, atol=1e-2, rtol=1e-2)
    rel2 = float(jnp.linalg.norm(out2 - ref2_f) / (jnp.linalg.norm(ref2_f) + 1e-12))
    assert rel2 < 0.05

    print("KERNEL_OK")
</pallas_src>

<mosaic_0001>
module attributes {stable_mosaic.version = 11 : i64} {
  func.func @_decoder_kernel(%arg0: i32, %arg1: i32, %arg2: memref<16x128xbf16, #tpu.memory_space<vmem>>, %arg3: memref<128x128xbf16, #tpu.memory_space<vmem>>, %arg4: memref<1x128xf32, #tpu.memory_space<vmem>>, %arg5: memref<128x128xbf16, #tpu.memory_space<vmem>>, %arg6: memref<1x128xf32, #tpu.memory_space<vmem>>, %arg7: memref<16x128xf32, #tpu.memory_space<vmem>>, %arg8: memref<16x128xbf16, #tpu.memory_space<vmem>>) attributes {dimension_semantics = [#tpu.dimension_semantics<parallel>, #tpu.dimension_semantics<arbitrary>], iteration_bounds = array<i64: 1, 1>, scalar_prefetch = 0 : i64, scratch_operands = 1 : i64, tpu.core_type = #tpu.core_type<tc>, window_params = [{transform_indices = @transform_0, window_bounds = array<i64: 16, 128>}, {pipeline_mode = #tpu.pipeline_mode<synchronous>, transform_indices = @transform_1, window_bounds = array<i64: 128, 128>}, {pipeline_mode = #tpu.pipeline_mode<synchronous>, transform_indices = @transform_2, window_bounds = array<i64: 1, 128>}, {transform_indices = @transform_3, window_bounds = array<i64: 128, 128>}, {transform_indices = @transform_4, window_bounds = array<i64: 1, 128>}, {transform_indices = @transform_5, window_bounds = array<i64: 16, 128>}]} {
    %c0_i32 = arith.constant 0 : i32
    %0 = arith.cmpi eq, %arg1, %c0_i32 : i32
    %1 = arith.extui %0 : i1 to i32
    %c0_i32_0 = arith.constant 0 : i32
    %2 = arith.cmpi ne, %1, %c0_i32_0 : i32
    scf.if %2 {
      %c0_8 = arith.constant 0 : index
      %c0_9 = arith.constant 0 : index
      %10 = vector.load %arg2[%c0_8, %c0_9] : memref<16x128xbf16, #tpu.memory_space<vmem>>, vector<16x128xbf16>
      %c0_10 = arith.constant 0 : index
      %c0_11 = arith.constant 0 : index
      %11 = vector.load %arg3[%c0_10, %c0_11] : memref<128x128xbf16, #tpu.memory_space<vmem>>, vector<128x128xbf16>
      %cst_12 = arith.constant dense<0.000000e+00> : vector<16x128xf32>
      %12 = tpu.matmul %10, %11, %cst_12 {dimension_numbers = #tpu.dot_dimension_numbers<[1], [0], [0], [1], [0, 0, 1, 1], [], []>} : vector<16x128xbf16>, vector<128x128xbf16>, vector<16x128xf32> -> vector<16x128xf32>
      %c0_13 = arith.constant 0 : index
      %c0_14 = arith.constant 0 : index
      %13 = vector.load %arg4[%c0_13, %c0_14] : memref<1x128xf32, #tpu.memory_space<vmem>>, vector<1x128xf32>
      %14 = vector.broadcast %13 : vector<1x128xf32> to vector<16x128xf32>
      %15 = arith.addf %12, %14 : vector<16x128xf32>
      %16 = arith.truncf %15 : vector<16x128xf32> to vector<16x128xbf16>
      %c0_15 = arith.constant 0 : index
      %c0_16 = arith.constant 0 : index
      %17 = vector.load %arg8[%c0_15, %c0_16] : memref<16x128xbf16, #tpu.memory_space<vmem>>, vector<16x128xbf16>
      tpu.vector_store %arg8[%c0_15, %c0_16], %16 {strides = array<i32>} : memref<16x128xbf16, #tpu.memory_space<vmem>>, vector<16x128xbf16>,
    } else {
    }
    %c0 = arith.constant 0 : index
    %c0_1 = arith.constant 0 : index
    %3 = vector.load %arg8[%c0, %c0_1] : memref<16x128xbf16, #tpu.memory_space<vmem>>, vector<16x128xbf16>
    %c0_2 = arith.constant 0 : index
    %c0_3 = arith.constant 0 : index
    %4 = vector.load %arg5[%c0_2, %c0_3] : memref<128x128xbf16, #tpu.memory_space<vmem>>, vector<128x128xbf16>
    %cst = arith.constant dense<0.000000e+00> : vector<16x128xf32>
    %5 = tpu.matmul %3, %4, %cst {dimension_numbers = #tpu.dot_dimension_numbers<[1], [0], [0], [1], [0, 0, 1, 1], [], []>} : vector<16x128xbf16>, vector<128x128xbf16>, vector<16x128xf32> -> vector<16x128xf32>
    %c0_4 = arith.constant 0 : index
    %c0_5 = arith.constant 0 : index
    %6 = vector.load %arg6[%c0_4, %c0_5] : memref<1x128xf32, #tpu.memory_space<vmem>>, vector<1x128xf32>
    %7 = vector.broadcast %6 : vector<1x128xf32> to vector<16x128xf32>
    %8 = arith.addf %5, %7 : vector<16x128xf32>
    %c0_6 = arith.constant 0 : index
    %c0_7 = arith.constant 0 : index
    %9 = vector.load %arg7[%c0_6, %c0_7] : memref<16x128xf32, #tpu.memory_space<vmem>>, vector<16x128xf32>
    tpu.vector_store %arg7[%c0_6, %c0_7], %8 {strides = array<i32>} : memref<16x128xf32, #tpu.memory_space<vmem>>, vector<16x128xf32>,
    return
  }
  func.func @transform_0(%arg0: i32, %arg1: i32) -> (i32, i32) {
    %c0_i32 = arith.constant 0 : i32
    %c0_i32_0 = arith.constant 0 : i32
    return %arg0, %c0_i32 : i32, i32
  }
  func.func @transform_1(%arg0: i32, %arg1: i32) -> (i32, i32) {
    %c0_i32 = arith.constant 0 : i32
    %c0_i32_0 = arith.constant 0 : i32
    %c0_i32_1 = arith.constant 0 : i32
    return %c0_i32, %c0_i32_0 : i32, i32
  }
  func.func @transform_2(%arg0: i32, %arg1: i32) -> (i32, i32) {
    %c0_i32 = arith.constant 0 : i32
    %c0_i32_0 = arith.constant 0 : i32
    %c0_i32_1 = arith.constant 0 : i32
    return %c0_i32, %c0_i32_0 : i32, i32
  }
  func.func @transform_3(%arg0: i32, %arg1: i32) -> (i32, i32) {
    %c0_i32 = arith.constant 0 : i32
    %c0_i32_0 = arith.constant 0 : i32
    return %c0_i32, %arg1 : i32, i32
  }
  func.func @transform_4(%arg0: i32, %arg1: i32) -> (i32, i32) {
    %c0_i32 = arith.constant 0 : i32
    %c0_i32_0 = arith.constant 0 : i32
    return %c0_i32, %arg1 : i32, i32
  }
  func.func @transform_5(%arg0: i32, %arg1: i32) -> (i32, i32) {
    %c0_i32 = arith.constant 0 : i32
    return %arg0, %arg1 : i32, i32
  }
}

module attributes {stable_mosaic.version = 11 : i64} {
  func.func @_decoder_kernel(%arg0: i32, %arg1: i32, %arg2: memref<16x128xbf16, #tpu.memory_space<vmem>>, %arg3: memref<128x128xbf16, #tpu.memory_space<vmem>>, %arg4: memref<1x128xf32, #tpu.memory_space<vmem>>, %arg5: memref<128x128xbf16, #tpu.memory_space<vmem>>, %arg6: memref<1x128xf32, #tpu.memory_space<vmem>>, %arg7: memref<16x128xf32, #tpu.memory_space<vmem>>, %arg8: memref<16x128xbf16, #tpu.memory_space<vmem>>) attributes {dimension_semantics = [#tpu.dimension_semantics<parallel>, #tpu.dimension_semantics<arbitrary>], iteration_bounds = array<i64: 1, 1>, scalar_prefetch = 0 : i64, scratch_operands = 1 : i64, tpu.core_type = #tpu.core_type<tc>, window_params = [{transform_indices = @transform_0, window_bounds = array<i64: 16, 128>}, {pipeline_mode = #tpu.pipeline_mode<synchronous>, transform_indices = @transform_1, window_bounds = array<i64: 128, 128>}, {pipeline_mode = #tpu.pipeline_mode<synchronous>, transform_indices = @transform_2, window_bounds = array<i64: 1, 128>}, {transform_indices = @transform_3, window_bounds = array<i64: 128, 128>}, {transform_indices = @transform_4, window_bounds = array<i64: 1, 128>}, {transform_indices = @transform_5, window_bounds = array<i64: 16, 128>}]} {
    %c0_i32 = arith.constant 0 : i32
    %0 = arith.cmpi eq, %arg1, %c0_i32 : i32
    %1 = arith.extui %0 : i1 to i32
    %c0_i32_0 = arith.constant 0 : i32
    %2 = arith.cmpi ne, %1, %c0_i32_0 : i32
    scf.if %2 {
      %c0_8 = arith.constant 0 : index
      %c0_9 = arith.constant 0 : index
      %10 = vector.load %arg2[%c0_8, %c0_9] : memref<16x128xbf16, #tpu.memory_space<vmem>>, vector<16x128xbf16>
      %c0_10 = arith.constant 0 : index
      %c0_11 = arith.constant 0 : index
      %11 = vector.load %arg3[%c0_10, %c0_11] : memref<128x128xbf16, #tpu.memory_space<vmem>>, vector<128x128xbf16>
      %cst_12 = arith.constant dense<0.000000e+00> : vector<16x128xf32>
      %12 = tpu.matmul %10, %11, %cst_12 {dimension_numbers = #tpu.dot_dimension_numbers<[1], [0], [0], [1], [0, 0, 1, 1], [], []>} : vector<16x128xbf16>, vector<128x128xbf16>, vector<16x128xf32> -> vector<16x128xf32>
      %c0_13 = arith.constant 0 : index
      %c0_14 = arith.constant 0 : index
      %13 = vector.load %arg4[%c0_13, %c0_14] : memref<1x128xf32, #tpu.memory_space<vmem>>, vector<1x128xf32>
      %14 = vector.broadcast %13 : vector<1x128xf32> to vector<16x128xf32>
      %15 = arith.addf %12, %14 : vector<16x128xf32>
      %16 = arith.truncf %15 : vector<16x128xf32> to vector<16x128xbf16>
      %c0_15 = arith.constant 0 : index
      %c0_16 = arith.constant 0 : index
      %17 = vector.load %arg8[%c0_15, %c0_16] : memref<16x128xbf16, #tpu.memory_space<vmem>>, vector<16x128xbf16>
      tpu.vector_store %arg8[%c0_15, %c0_16], %16 {strides = array<i32>} : memref<16x128xbf16, #tpu.memory_space<vmem>>, vector<16x128xbf16>,
    } else {
    }
    %c0 = arith.constant 0 : index
    %c0_1 = arith.constant 0 : index
    %3 = vector.load %arg8[%c0, %c0_1] : memref<16x128xbf16, #tpu.memory_space<vmem>>, vector<16x128xbf16>
    %c0_2 = arith.constant 0 : index
    %c0_3 = arith.constant 0 : index
    %4 = vector.load %arg5[%c0_2, %c0_3] : memref<128x128xbf16, #tpu.memory_space<vmem>>, vector<128x128xbf16>
    %cst = arith.constant dense<0.000000e+00> : vector<16x128xf32>
    %5 = tpu.matmul %3, %4, %cst {dimension_numbers = #tpu.dot_dimension_numbers<[1], [0], [0], [1], [0, 0, 1, 1], [], []>} : vector<16x128xbf16>, vector<128x128xbf16>, vector<16x128xf32> -> vector<16x128xf32>
    %c0_4 = arith.constant 0 : index
    %c0_5 = arith.constant 0 : index
    %6 = vector.load %arg6[%c0_4, %c0_5] : memref<1x128xf32, #tpu.memory_space<vmem>>, vector<1x128xf32>
    %7 = vector.broadcast %6 : vector<1x128xf32> to vector<16x128xf32>
    %8 = arith.addf %5, %7 : vector<16x128xf32>
    %c0_6 = arith.constant 0 : index
    %c0_7 = arith.constant 0 : index
    %9 = vector.load %arg7[%c0_6, %c0_7] : memref<16x128xf32, #tpu.memory_space<vmem>>, vector<16x128xf32>
    tpu.vector_store %arg7[%c0_6, %c0_7], %8 {strides = array<i32>} : memref<16x128xf32, #tpu.memory_space<vmem>>, vector<16x128xf32>,
    return
  }
  func.func @transform_0(%arg0: i32, %arg1: i32) -> (i32, i32) {
    %c0_i32 = arith.constant 0 : i32
    %c0_i32_0 = arith.constant 0 : i32
    return %arg0, %c0_i32 : i32, i32
  }
  func.func @transform_1(%arg0: i32, %arg1: i32) -> (i32, i32) {
    %c0_i32 = arith.constant 0 : i32
    %c0_i32_0 = arith.constant 0 : i32
    %c0_i32_1 = arith.constant 0 : i32
    return %c0_i32, %c0_i32_0 : i32, i32
  }
  func.func @transform_2(%arg0: i32, %arg1: i32) -> (i32, i32) {
    %c0_i32 = arith.constant 0 : i32
    %c0_i32_0 = arith.constant 0 : i32
    %c0_i32_1 = arith.constant 0 : i32
    return %c0_i32, %c0_i32_0 : i32, i32
  }
  func.func @transform_3(%arg0: i32, %arg1: i32) -> (i32, i32) {
    %c0_i32 = arith.constant 0 : i32
    %c0_i32_0 = arith.constant 0 : i32
    return %c0_i32, %arg1 : i32, i32
  }
  func.func @transform_4(%arg0: i32, %arg1: i32) -> (i32, i32) {
    %c0_i32 = arith.constant 0 : i32
    %c0_i32_0 = arith.constant 0 : i32
    return %c0_i32, %arg1 : i32, i32
  }
  func.func @transform_5(%arg0: i32, %arg1: i32) -> (i32, i32) {
    %c0_i32 = arith.constant 0 : i32
    return %arg0, %arg1 : i32, i32
  }
}

</mosaic_0001>

<bundles_post_ra>
// kernel: tpu_custom_call.1
= control target key start
LH: loop header
LB: loop body
LE: loop exit
PB: predicated region body
PF: predicated region fallthrough
CT: control target
= control target key end

     0   :  { %10 = vsyncpa [#allocation4], 0  ;;  %s596_s0 = inlined_call_operand.hbm [shape: bf16[16,128], index: 0, kind: input, shape index: {}]   ;;  %s597_s1 = inlined_call_operand.hbm [shape: bf16[128,128], index: 1, kind: input, shape index: {}]   ;;  %s598_s2 = inlined_call_operand.vmem [shape: f32[1,128], index: 2, kind: input, shape index: {}]   ;;  %s599_s3 = inlined_call_operand.hbm [shape: bf16[128,128], index: 3, kind: input, shape index: {}]   ;;  %s600_s4 = inlined_call_operand.vmem [shape: f32[1,128], index: 4, kind: input, shape index: {}]   ;;  %s601_s5 = inlined_call_operand.hbm [shape: f32[16,128], index: 5, kind: output, shape index: {}]  }
   0x1   :  { %11 = vsyncpa [#allocation7], 0 }
   0x2   :  { %12 = vsyncpa [#allocation5], 0  ;;  %s538_s18 = smov [#allocation6]   ;;  %s539_s20 = smov [#allocation3]  }
   0x3   :  { %s30_s19 = sshll.u32 %s538_s18, 4  ;;  %s18_s21 = sshll.u32 %s539_s20, 4  ;;  %s31_s19 = int_to_ptr.vmem [resolvable:$true] %s30_s19  ;;  %s19_s21 = int_to_ptr.vmem [resolvable:$true] %s18_s21 }
   0x4   :  { %s460_s22 = scalar_lea.vmem %s31_s19, 1024  ;;  %p465_p1 = scmp.lt.s32.totalorder %s31_s19, %s31_s19 }
   0x5   :  { %p461_p0 = scmp.ne.s32.totalorder %s31_s19, %s460_s22  ;;  %p466_p2 = scmp.lt.s32.totalorder %s460_s22, %s460_s22 }
   0x7   :  { %p467_p3 = por %p466_p2, %p465_p1 }
   0x9   :  { %p468_p4 = pnand %p467_p3, %p461_p0 }
   0xb   :  { %471 = shalt.err (!%p468_p4)
}
   0xc   :  { %s540_s23 = smov 64   ;;  %s541_s24 = smov 4  }
   0xd   :  { %36 = dma.hbm_to_vmem [thread:$0]  %s597_s1, 1024, %s31_s19, [#allocation7], %s540_s23, %s540_s23, %s541_s24  }
   0xe   :  { %s480_s27 = scalar_lea.vmem %s19_s21, 128  ;;  %p485_p6 = scmp.lt.s32.totalorder %s19_s21, %s19_s21 }
   0xf   :  { %p481_p5 = scmp.ne.s32.totalorder %s19_s21, %s480_s27  ;;  %p486_p7 = scmp.lt.s32.totalorder %s480_s27, %s480_s27 }
  0x11   :  { %p487_p8 = por %p486_p7, %p485_p6 }
  0x13   :  { %p488_p9 = pnand %p487_p8, %p481_p5 }
  0x15   :  { %491 = shalt.err (!%p488_p9)
}
  0x16   :  { %24 = dma.hbm_to_vmem [thread:$0]  %s596_s0, 128, %s19_s21, [#allocation4], %s540_s23, %s540_s23, %s541_s24  }
  0x17   :  { %s542_s30 = smov [#allocation8]  }
  0x18   :  { %s44_s6 = sshll.u32 %s542_s30, 4  ;;  %s45_s6 = int_to_ptr.vmem [resolvable:$true] %s44_s6 }
  0x19   :  { %s500_s7 = scalar_lea.vmem %s45_s6, 1024  ;;  %p505_p11 = scmp.lt.s32.totalorder %s45_s6, %s45_s6 }
  0x1a   :  { %p501_p10 = scmp.ne.s32.totalorder %s45_s6, %s500_s7  ;;  %p506_p12 = scmp.lt.s32.totalorder %s500_s7, %s500_s7 }
  0x1c   :  { %p507_p13 = por %p506_p12, %p505_p11 }
  0x1e   :  { %p508_p0 = pnand %p507_p13, %p501_p10 }
  0x20   :  { %511 = shalt.err (!%p508_p0)
}
  0x21   :  { %50 = dma.hbm_to_vmem [thread:$0]  %s599_s3, 1024, %s45_s6, [#allocation7], %s540_s23, %s540_s23, %s541_s24  }
  0x22   :  { %532 = dma.done.wait [#allocation4], 128  }
  0x23   :  { %533 = vsyncadd [#allocation4], 4294967168 }
  0x24   :  { %534 = dma.done.wait [#allocation7], 2048  }
  0x25   :  { %535 = vsyncadd [#allocation7], 4294965248  ;;  %v543_v0 = vmov 0.0   ;;  %vm544_vm0 = vmmov 0   ;;  %v434_v1 = vld [vmem:[#allocation6 + $0x38] sm:$0xff]   ;;  %v435_v2 = vld [vmem:[#allocation6 + $0x30] sm:$0xff]  }
  0x26   :  { %384 = vmatprep.subr.bf16.mxu0 %v543_v0  ;;  %400 = vmatprep.mubr.msk.bf16.mxu0 %vm544_vm0, %v543_v0  ;;  %v436_v3 = vld [vmem:[#allocation6 + $0x28] sm:$0xff]   ;;  %v443_v4 = vld [vmem:[#allocation8 + $0x38] sm:$0xff]   ;;  %v437_v5 = vld [vmem:[#allocation6 + $0x20] sm:$0xff]   ;;  %s545_s11 = smov [#allocation9]  }
  0x27   :  { %404 = vmatprep.subr.bf16.mxu1 %v543_v0  ;;  %420 = vmatprep.mubr.msk.bf16.mxu1 %vm544_vm0, %v543_v0  ;;  %v444_v6 = vld [vmem:[#allocation8 + $0x30] sm:$0xff]   ;;  %v438_v7 = vld [vmem:[#allocation6 + $0x18] sm:$0xff]   ;;  %v445_v8 = vld [vmem:[#allocation8 + $0x28] sm:$0xff]   ;;  %s324_s12 = sshll.u32 %s545_s11, 4  ;;  %s325_s12 = int_to_ptr.vmem [resolvable:$true] %s324_s12 }
  0x28   :  { %385 = vmatpush3.bf16.msra.mxu0 %v434_v1  ;;  %405 = vmatpush3.bf16.msra.mxu1 %v443_v4  ;;  %v439_v9 = vld [vmem:[#allocation6 + $0x10] sm:$0xff]   ;;  %v440_v10 = vld [vmem:[#allocation6 + $0x8] sm:$0xff]   ;;  %v441_v11 = vld [vmem:[#allocation6] sm:$0xff]   ;;  %p517_p2 = scmp.lt.s32.totalorder %s325_s12, %s325_s12 }
  0x29   :  { %386 = vmatprep.subr.bf16.mxu0 %v543_v0  ;;  %406 = vmatprep.subr.bf16.mxu1 %v543_v0  ;;  %v442_v12 = vld [vmem:[#allocation3] sm:$0xff]   ;;  %v446_v13 = vld [vmem:[#allocation8 + $0x20] sm:$0xff]   ;;  %v448_v15 = vld [vmem:[#allocation8 + $0x10] sm:$0xff]  }
  0x2a   :  { %v447_v14 = vld [vmem:[#allocation8 + $0x18] sm:$0xff]   ;;  %v449_v16 = vld [vmem:[#allocation8 + $0x8] sm:$0xff]   ;;  %v450_v17 = vld [vmem:[#allocation8] sm:$0xff]  }
  0x2b   :  { %v337_v19 = vld [vmem:[%s598_s2] ss:$0 sm:$0xff]  ;;  %s512_s2 = scalar_lea.vmem %s325_s12, 256 }
  0x2c   :  { %387 = vmatpush3.bf16.msra.mxu0 %v435_v2  ;;  %407 = vmatpush3.bf16.msra.mxu1 %v444_v6  ;;  %v349_v27 = vld [vmem:[%s600_s4] ss:$0 sm:$0xff]  ;;  %p513_p1 = scmp.ne.s32.totalorder %s325_s12, %s512_s2  ;;  %p518_p3 = scmp.lt.s32.totalorder %s512_s2, %s512_s2 }
  0x2d   :  { %388 = vmatprep.subr.bf16.mxu0 %v543_v0  ;;  %408 = vmatprep.subr.bf16.mxu1 %v543_v0 }
  0x2e   :  { %p519_p4 = por %p518_p3, %p517_p2 }
  0x30   :  { %389 = vmatpush3.bf16.msra.mxu0 %v436_v3  ;;  %409 = vmatpush3.bf16.msra.mxu1 %v445_v8  ;;  %p520_p5 = pnand %p519_p4, %p513_p1 }
  0x31   :  { %390 = vmatprep.subr.bf16.mxu0 %v543_v0  ;;  %410 = vmatprep.subr.bf16.mxu1 %v543_v0 }
  0x34   :  { %391 = vmatpush3.bf16.msra.mxu0 %v437_v5  ;;  %411 = vmatpush3.bf16.msra.mxu1 %v446_v13 }
  0x35   :  { %392 = vmatprep.subr.bf16.mxu0 %v543_v0  ;;  %412 = vmatprep.subr.bf16.mxu1 %v543_v0 }
  0x38   :  { %393 = vmatpush3.bf16.msra.mxu0 %v438_v7  ;;  %413 = vmatpush3.bf16.msra.mxu1 %v447_v14 }
  0x39   :  { %394 = vmatprep.subr.bf16.mxu0 %v543_v0  ;;  %414 = vmatprep.subr.bf16.mxu1 %v543_v0 }
  0x3c   :  { %395 = vmatpush3.bf16.msra.mxu0 %v439_v9  ;;  %415 = vmatpush3.bf16.msra.mxu1 %v448_v15 }
  0x3d   :  { %396 = vmatprep.subr.bf16.mxu0 %v543_v0  ;;  %416 = vmatprep.subr.bf16.mxu1 %v543_v0 }
  0x40   :  { %397 = vmatpush3.bf16.msra.mxu0 %v440_v10  ;;  %417 = vmatpush3.bf16.msra.mxu1 %v449_v16 }
  0x41   :  { %398 = vmatprep.subr.bf16.mxu0 %v543_v0  ;;  %418 = vmatprep.subr.bf16.mxu1 %v543_v0 }
  0x44   :  { %399 = vmatpush3.bf16.msra.mxu0 %v441_v11  ;;  %419 = vmatpush3.bf16.msra.mxu1 %v450_v17 }
  0x47   :  { %401 = vmatmul.mubr.bf16.vlgmr.msra.gmra.mxu0 %v442_v12 }
 0x107   :  { %v180_v18 = vpop.f32.mrf.mxu0 }
 0x108   :  { %v181_v22 = vadd.f32 %v337_v19, %v180_v18 }
 0x109   :  { %v402_v20 = vpop.f32.mrf.mxu0 }
 0x10b   :  { %v183_v21 = vpop.f32.mrf.mxu0 }
 0x10c   :  { %v184_v23 = vadd.f32 %v337_v19, %v183_v21 }
 0x10d   :  { %v403_v24 = vpop.f32.mrf.mxu0 }
 0x10e   :  { %v364_v25 = vpack.c.bf16 %v184_v23, %v181_v22 }
 0x110   :  { %365 = vst [vmem:[#allocation2] sm:$0xff] %v364_v25  }
 0x117   :  { %v451_v26 = vld [vmem:[#allocation2] sm:$0xff]  }
 0x118   :  { %421 = vmatmul.mubr.bf16.vlgmr.msra.gmra.mxu1 %v451_v26 }
 0x1d8   :  { %v310_v28 = vpop.f32.mrf.mxu1 }
 0x1d9   :  { %v311_v29 = vadd.f32 %v349_v27, %v310_v28 }
 0x1da   :  { %v422_v30 = vpop.f32.mrf.mxu1 }
 0x1db   :  { %317 = vst [vmem:[#allocation9] sm:$0xff] %v311_v29 }
 0x1dc   :  { %v313_v31 = vpop.f32.mrf.mxu1 }
 0x1dd   :  { %v314_v32 = vadd.f32 %v349_v27, %v313_v31 }
 0x1de   :  { %v423_v33 = vpop.f32.mrf.mxu1 }
 0x1df   :  { %318 = vst [vmem:[#allocation9 + $0x8] sm:$0xff] %v314_v32 }
 0x1e0   :  { %523 = shalt.err (!%p520_p5)
}
 0x1e1   :  { %s546_s13 = smov 128   ;;  %s547_s4 = smov 8  }
 0x1e2   :  { %330 = dma.vmem_to_hbm [thread:$0]  %s325_s12, 256, %s601_s5, [#allocation5], %s546_s13, %s546_s13, %s547_s4  }
 0x1e3   :  { %536 = dma.done.wait [#allocation5], 256  }
 0x1e4   :  { %537 = vsyncadd [#allocation5], 4294967040 }
 0x1e5   :  { %334 = vsyncpa [#allocation4], 1 }
 0x1e6   :  { %335 = vsyncpa [#allocation7], 1 }
 0x1e7   :  { %336 = vsyncpa [#allocation5], 1 }

// kernel: tpu_custom_call.1
= control target key start
LH: loop header
LB: loop body
LE: loop exit
PB: predicated region body
PF: predicated region fallthrough
CT: control target
= control target key end

     0   :  { %10 = vsyncpa [#allocation4], 0  ;;  %s596_s0 = inlined_call_operand.hbm [shape: bf16[16,128], index: 0, kind: input, shape index: {}]   ;;  %s597_s1 = inlined_call_operand.hbm [shape: bf16[128,128], index: 1, kind: input, shape index: {}]   ;;  %s598_s2 = inlined_call_operand.vmem [shape: f32[1,128], index: 2, kind: input, shape index: {}]   ;;  %s599_s3 = inlined_call_operand.hbm [shape: bf16[128,128], index: 3, kind: input, shape index: {}]   ;;  %s600_s4 = inlined_call_operand.vmem [shape: f32[1,128], index: 4, kind: input, shape index: {}]   ;;  %s601_s5 = inlined_call_operand.hbm [shape: f32[16,128], index: 5, kind: output, shape index: {}]  }
   0x1   :  { %11 = vsyncpa [#allocation7], 0 }
   0x2   :  { %12 = vsyncpa [#allocation5], 0  ;;  %s538_s18 = smov [#allocation6]   ;;  %s539_s20 = smov [#allocation3]  }
   0x3   :  { %s30_s19 = sshll.u32 %s538_s18, 4  ;;  %s18_s21 = sshll.u32 %s539_s20, 4  ;;  %s31_s19 = int_to_ptr.vmem [resolvable:$true] %s30_s19  ;;  %s19_s21 = int_to_ptr.vmem [resolvable:$true] %s18_s21 }
   0x4   :  { %s460_s22 = scalar_lea.vmem %s31_s19, 1024  ;;  %p465_p1 = scmp.lt.s32.totalorder %s31_s19, %s31_s19 }
   0x5   :  { %p461_p0 = scmp.ne.s32.totalorder %s31_s19, %s460_s22  ;;  %p466_p2 = scmp.lt.s32.totalorder %s460_s22, %s460_s22 }
   0x7   :  { %p467_p3 = por %p466_p2, %p465_p1 }
   0x9   :  { %p468_p4 = pnand %p467_p3, %p461_p0 }
   0xb   :  { %471 = shalt.err (!%p468_p4)
}
   0xc   :  { %s540_s23 = smov 64   ;;  %s541_s24 = smov 4  }
   0xd   :  { %36 = dma.hbm_to_vmem [thread:$0]  %s597_s1, 1024, %s31_s19, [#allocation7], %s540_s23, %s540_s23, %s541_s24  }
   0xe   :  { %s480_s27 = scalar_lea.vmem %s19_s21, 128  ;;  %p485_p6 = scmp.lt.s32.totalorder %s19_s21, %s19_s21 }
   0xf   :  { %p481_p5 = scmp.ne.s32.totalorder %s19_s21, %s480_s27  ;;  %p486_p7 = scmp.lt.s32.totalorder %s480_s27, %s480_s27 }
  0x11   :  { %p487_p8 = por %p486_p7, %p485_p6 }
  0x13   :  { %p488_p9 = pnand %p487_p8, %p481_p5 }
  0x15   :  { %491 = shalt.err (!%p488_p9)
}
  0x16   :  { %24 = dma.hbm_to_vmem [thread:$0]  %s596_s0, 128, %s19_s21, [#allocation4], %s540_s23, %s540_s23, %s541_s24  }
  0x17   :  { %s542_s30 = smov [#allocation8]  }
  0x18   :  { %s44_s6 = sshll.u32 %s542_s30, 4  ;;  %s45_s6 = int_to_ptr.vmem [resolvable:$true] %s44_s6 }
  0x19   :  { %s500_s7 = scalar_lea.vmem %s45_s6, 1024  ;;  %p505_p11 = scmp.lt.s32.totalorder %s45_s6, %s45_s6 }
  0x1a   :  { %p501_p10 = scmp.ne.s32.totalorder %s45_s6, %s500_s7  ;;  %p506_p12 = scmp.lt.s32.totalorder %s500_s7, %s500_s7 }
  0x1c   :  { %p507_p13 = por %p506_p12, %p505_p11 }
  0x1e   :  { %p508_p0 = pnand %p507_p13, %p501_p10 }
  0x20   :  { %511 = shalt.err (!%p508_p0)
}
  0x21   :  { %50 = dma.hbm_to_vmem [thread:$0]  %s599_s3, 1024, %s45_s6, [#allocation7], %s540_s23, %s540_s23, %s541_s24  }
  0x22   :  { %532 = dma.done.wait [#allocation4], 128  }
  0x23   :  { %533 = vsyncadd [#allocation4], 4294967168 }
  0x24   :  { %534 = dma.done.wait [#allocation7], 2048  }
  0x25   :  { %535 = vsyncadd [#allocation7], 4294965248  ;;  %v543_v0 = vmov 0.0   ;;  %vm544_vm0 = vmmov 0   ;;  %v434_v1 = vld [vmem:[#allocation6 + $0x38] sm:$0xff]   ;;  %v435_v2 = vld [vmem:[#allocation6 + $0x30] sm:$0xff]  }
  0x26   :  { %384 = vmatprep.subr.bf16.mxu0 %v543_v0  ;;  %400 = vmatprep.mubr.msk.bf16.mxu0 %vm544_vm0, %v543_v0  ;;  %v436_v3 = vld [vmem:[#allocation6 + $0x28] sm:$0xff]   ;;  %v443_v4 = vld [vmem:[#allocation8 + $0x38] sm:$0xff]   ;;  %v437_v5 = vld [vmem:[#allocation6 + $0x20] sm:$0xff]   ;;  %s545_s11 = smov [#allocation9]  }
  0x27   :  { %404 = vmatprep.subr.bf16.mxu1 %v543_v0  ;;  %420 = vmatprep.mubr.msk.bf16.mxu1 %vm544_vm0, %v543_v0  ;;  %v444_v6 = vld [vmem:[#allocation8 + $0x30] sm:$0xff]   ;;  %v438_v7 = vld [vmem:[#allocation6 + $0x18] sm:$0xff]   ;;  %v445_v8 = vld [vmem:[#allocation8 + $0x28] sm:$0xff]   ;;  %s324_s12 = sshll.u32 %s545_s11, 4  ;;  %s325_s12 = int_to_ptr.vmem [resolvable:$true] %s324_s12 }
  0x28   :  { %385 = vmatpush3.bf16.msra.mxu0 %v434_v1  ;;  %405 = vmatpush3.bf16.msra.mxu1 %v443_v4  ;;  %v439_v9 = vld [vmem:[#allocation6 + $0x10] sm:$0xff]   ;;  %v440_v10 = vld [vmem:[#allocation6 + $0x8] sm:$0xff]   ;;  %v441_v11 = vld [vmem:[#allocation6] sm:$0xff]   ;;  %p517_p2 = scmp.lt.s32.totalorder %s325_s12, %s325_s12 }
  0x29   :  { %386 = vmatprep.subr.bf16.mxu0 %v543_v0  ;;  %406 = vmatprep.subr.bf16.mxu1 %v543_v0  ;;  %v442_v12 = vld [vmem:[#allocation3] sm:$0xff]   ;;  %v446_v13 = vld [vmem:[#allocation8 + $0x20] sm:$0xff]   ;;  %v448_v15 = vld [vmem:[#allocation8 + $0x10] sm:$0xff]  }
  0x2a   :  { %v447_v14 = vld [vmem:[#allocation8 + $0x18] sm:$0xff]   ;;  %v449_v16 = vld [vmem:[#allocation8 + $0x8] sm:$0xff]   ;;  %v450_v17 = vld [vmem:[#allocation8] sm:$0xff]  }
  0x2b   :  { %v337_v19 = vld [vmem:[%s598_s2] ss:$0 sm:$0xff]  ;;  %s512_s2 = scalar_lea.vmem %s325_s12, 256 }
  0x2c   :  { %387 = vmatpush3.bf16.msra.mxu0 %v435_v2  ;;  %407 = vmatpush3.bf16.msra.mxu1 %v444_v6  ;;  %v349_v27 = vld [vmem:[%s600_s4] ss:$0 sm:$0xff]  ;;  %p513_p1 = scmp.ne.s32.totalorder %s325_s12, %s512_s2  ;;  %p518_p3 = scmp.lt.s32.totalorder %s512_s2, %s512_s2 }
  0x2d   :  { %388 = vmatprep.subr.bf16.mxu0 %v543_v0  ;;  %408 = vmatprep.subr.bf16.mxu1 %v543_v0 }
  0x2e   :  { %p519_p4 = por %p518_p3, %p517_p2 }
  0x30   :  { %389 = vmatpush3.bf16.msra.mxu0 %v436_v3  ;;  %409 = vmatpush3.bf16.msra.mxu1 %v445_v8  ;;  %p520_p5 = pnand %p519_p4, %p513_p1 }
  0x31   :  { %390 = vmatprep.subr.bf16.mxu0 %v543_v0  ;;  %410 = vmatprep.subr.bf16.mxu1 %v543_v0 }
  0x34   :  { %391 = vmatpush3.bf16.msra.mxu0 %v437_v5  ;;  %411 = vmatpush3.bf16.msra.mxu1 %v446_v13 }
  0x35   :  { %392 = vmatprep.subr.bf16.mxu0 %v543_v0  ;;  %412 = vmatprep.subr.bf16.mxu1 %v543_v0 }
  0x38   :  { %393 = vmatpush3.bf16.msra.mxu0 %v438_v7  ;;  %413 = vmatpush3.bf16.msra.mxu1 %v447_v14 }
  0x39   :  { %394 = vmatprep.subr.bf16.mxu0 %v543_v0  ;;  %414 = vmatprep.subr.bf16.mxu1 %v543_v0 }
  0x3c   :  { %395 = vmatpush3.bf16.msra.mxu0 %v439_v9  ;;  %415 = vmatpush3.bf16.msra.mxu1 %v448_v15 }
  0x3d   :  { %396 = vmatprep.subr.bf16.mxu0 %v543_v0  ;;  %416 = vmatprep.subr.bf16.mxu1 %v543_v0 }
  0x40   :  { %397 = vmatpush3.bf16.msra.mxu0 %v440_v10  ;;  %417 = vmatpush3.bf16.msra.mxu1 %v449_v16 }
  0x41   :  { %398 = vmatprep.subr.bf16.mxu0 %v543_v0  ;;  %418 = vmatprep.subr.bf16.mxu1 %v543_v0 }
  0x44   :  { %399 = vmatpush3.bf16.msra.mxu0 %v441_v11  ;;  %419 = vmatpush3.bf16.msra.mxu1 %v450_v17 }
  0x47   :  { %401 = vmatmul.mubr.bf16.vlgmr.msra.gmra.mxu0 %v442_v12 }
 0x107   :  { %v180_v18 = vpop.f32.mrf.mxu0 }
 0x108   :  { %v181_v22 = vadd.f32 %v337_v19, %v180_v18 }
 0x109   :  { %v402_v20 = vpop.f32.mrf.mxu0 }
 0x10b   :  { %v183_v21 = vpop.f32.mrf.mxu0 }
 0x10c   :  { %v184_v23 = vadd.f32 %v337_v19, %v183_v21 }
 0x10d   :  { %v403_v24 = vpop.f32.mrf.mxu0 }
 0x10e   :  { %v364_v25 = vpack.c.bf16 %v184_v23, %v181_v22 }
 0x110   :  { %365 = vst [vmem:[#allocation2] sm:$0xff] %v364_v25  }
 0x117   :  { %v451_v26 = vld [vmem:[#allocation2] sm:$0xff]  }
 0x118   :  { %421 = vmatmul.mubr.bf16.vlgmr.msra.gmra.mxu1 %v451_v26 }
 0x1d8   :  { %v310_v28 = vpop.f32.mrf.mxu1 }
 0x1d9   :  { %v311_v29 = vadd.f32 %v349_v27, %v310_v28 }
 0x1da   :  { %v422_v30 = vpop.f32.mrf.mxu1 }
 0x1db   :  { %317 = vst [vmem:[#allocation9] sm:$0xff] %v311_v29 }
 0x1dc   :  { %v313_v31 = vpop.f32.mrf.mxu1 }
 0x1dd   :  { %v314_v32 = vadd.f32 %v349_v27, %v313_v31 }
 0x1de   :  { %v423_v33 = vpop.f32.mrf.mxu1 }
 0x1df   :  { %318 = vst [vmem:[#allocation9 + $0x8] sm:$0xff] %v314_v32 }
 0x1e0   :  { %523 = shalt.err (!%p520_p5)
}
 0x1e1   :  { %s546_s13 = smov 128   ;;  %s547_s4 = smov 8  }
 0x1e2   :  { %330 = dma.vmem_to_hbm [thread:$0]  %s325_s12, 256, %s601_s5, [#allocation5], %s546_s13, %s546_s13, %s547_s4  }
 0x1e3   :  { %536 = dma.done.wait [#allocation5], 256  }
 0x1e4   :  { %537 = vsyncadd [#allocation5], 4294967040 }
 0x1e5   :  { %334 = vsyncpa [#allocation4], 1 }
 0x1e6   :  { %335 = vsyncpa [#allocation7], 1 }
 0x1e7   :  { %336 = vsyncpa [#allocation5], 1 }

</bundles_post_ra>
